<compile_context>
chip_gen: v7x
topology: tpu7x:2x2x1
jax: 0.10.0
libtpu: 0.0.40
codegen_flags: <defaults>
</compile_context>

<pallas_src>
import functools

import jax
import jax.numpy as jnp
from jax.experimental import pallas as pl
from jax.experimental.pallas import tpu as pltpu

LN_EPS = 1e-5  # torch.nn.LayerNorm default


def _image_proj_kernel(x_ref, w_ref, b_ref, g_ref, beta_ref, o_ref,
                       *, tokens_per_step, d):
    # x_ref:    (B, E)        input embeddings (constant block index -> resident)
    # w_ref:    (E, TPS*D)    this step's column block of the projection weight
    # b_ref:    (1, TPS*D)    this step's slice of the projection bias
    # g_ref:    (1, D)        LayerNorm gamma
    # beta_ref: (1, D)        LayerNorm beta
    # o_ref:    (B, TPS*D)    this step's column block of the flat output
    #
    # One MXU matmul covering all tokens of this step; f32 accumulation.
    y = jnp.dot(x_ref[...], w_ref[...], preferred_element_type=jnp.float32)
    y = y + b_ref[...].astype(jnp.float32)                      # (B, TPS*D)

    g = g_ref[...].astype(jnp.float32)
    beta = beta_ref[...].astype(jnp.float32)

    # Unrolled static loop over lane-aligned D-wide token slices.  All VPU/XLU/
    # EUP work here is free filler under the weight DMA (kernel is HBM-bound).
    for t in range(tokens_per_step):
        yt = y[:, t * d:(t + 1) * d]                             # (B, D)
        mean = jnp.mean(yt, axis=-1, keepdims=True)
        centered = yt - mean
        var = jnp.mean(centered * centered, axis=-1, keepdims=True)
        out_t = centered * jax.lax.rsqrt(var + LN_EPS) * g + beta
        o_ref[:, t * d:(t + 1) * d] = out_t.astype(o_ref.dtype)


def image_proj_model(image_embeds, proj_w, proj_b, ln_gamma, ln_beta,
                     *, clip_extra_context_tokens, cross_attention_dim):
    """Pallas implementation of ImageProjModel.forward.

    image_embeds: (B, E)
    proj_w:       (E, T*D)   (torch Linear weight, transposed once at load time)
    proj_b:       (T*D,)
    ln_gamma:     (D,)
    ln_beta:      (D,)
    returns:      (B, T, D)
    """
    B, E = image_embeds.shape
    T = clip_extra_context_tokens
    D = cross_attention_dim
    assert proj_w.shape == (E, T * D), proj_w.shape
    # Lane-dense column blocks and free in-kernel token slices require
    # D % 128 == 0 (true for production D=1024) or a single token.
    assert D % 128 == 0 or T == 1, (
        "cross_attention_dim must be a multiple of 128 (or T == 1) for "
        "lane-dense column-block slicing of proj_w")

    # ---- Grid sizing -------------------------------------------------------
    # Minimize grid steps (per-step overhead ~0.35 us dominates a weight-
    # streaming kernel), but keep >= 2 parallel steps when T > 1 so v7x's two
    # TensorCores each stream half the weights.
    if T == 1:
        num_steps = 1
    elif T % 2 == 0:
        num_steps = 2
    else:
        num_steps = T
    tokens_per_step = T // num_steps

    # If the W block would be huge (big f32 weights), split further to keep the
    # double-buffered block within a ~16 MiB budget.
    w_isz = jnp.dtype(proj_w.dtype).itemsize
    while (E * tokens_per_step * D * w_isz > (16 << 20)
           and tokens_per_step % 2 == 0):
        tokens_per_step //= 2
        num_steps *= 2

    TPS = tokens_per_step
    NCOL = TPS * D

    # ---- Pad B to a multiple of 8 (full sublanes, unmasked output stores) ---
    B_pad = ((B + 7) // 8) * 8
    x = image_embeds
    if B_pad != B:
        x = jnp.pad(x, ((0, B_pad - B), (0, 0)))
    # TODO(synk): if B ever grows large (>~256), add a B grid axis tiling
    # ~128-256 rows to bound the f32 LN intermediates and VMEM blocks.

    # Cheap reshapes only (layout-preserving views; no transpose, no data copy).
    b2 = proj_b.reshape(1, T * D)
    gamma = ln_gamma.reshape(1, D)
    beta = ln_beta.reshape(1, D)

    def _nbytes(a):
        return a.size * jnp.dtype(a.dtype).itemsize

    out_itemsize = jnp.dtype(image_embeds.dtype).itemsize
    cost = pl.CostEstimate(
        flops=2 * B_pad * E * T * D,
        transcendentals=B_pad * T,  # one rsqrt per (row, token)
        bytes_accessed=(_nbytes(x) + _nbytes(proj_w) + _nbytes(b2)
                        + _nbytes(gamma) + _nbytes(beta)
                        + B_pad * T * D * out_itemsize),
    )

    # VMEM budget: double-buffered W block dominates.  Keep the 32 MiB scoped
    # default as a floor, cap at 48 MiB to leave headroom on v7x (64 MiB phys).
    x_isz = jnp.dtype(x.dtype).itemsize
    vmem_needed = (2 * E * NCOL * w_isz              # W block (double-buffered)
                   + B_pad * E * x_isz               # x (resident)
                   + 2 * B_pad * NCOL * out_itemsize  # output block
                   + 2 * NCOL * jnp.dtype(b2.dtype).itemsize
                   + 2 * 2 * D * 4)                  # gamma / beta
    vmem_limit = min(max(int(1.5 * vmem_needed) + (1 << 20), 32 << 20), 48 << 20)

    kernel = functools.partial(_image_proj_kernel,
                               tokens_per_step=TPS, d=D)

    out_flat = pl.pallas_call(
        kernel,
        out_shape=jax.ShapeDtypeStruct((B_pad, T * D), image_embeds.dtype),
        grid_spec=pltpu.PrefetchScalarGridSpec(
            num_scalar_prefetch=0,
            grid=(num_steps,),
            in_specs=[
                pl.BlockSpec((B_pad, E), lambda s: (0, 0)),   # x (resident)
                pl.BlockSpec((E, NCOL), lambda s: (0, s)),    # W column block s
                pl.BlockSpec((1, NCOL), lambda s: (0, s)),    # bias slice s
                pl.BlockSpec((1, D), lambda s: (0, 0)),       # gamma
                pl.BlockSpec((1, D), lambda s: (0, 0)),       # beta
            ],
            out_specs=pl.BlockSpec((B_pad, NCOL), lambda s: (0, s)),
        ),
        compiler_params=pltpu.CompilerParams(
            dimension_semantics=("parallel",),
            vmem_limit_bytes=vmem_limit),
        cost_estimate=cost,
    )(x, proj_w, b2, gamma, beta)

    # Drop batch padding; free view (B, T*D) -> (B, T, D).
    if B_pad != B:
        out_flat = out_flat[:B]
    return out_flat.reshape(B, T, D)


def _reference(image_embeds, proj_w, proj_b, ln_gamma, ln_beta, T, D):
    y = image_embeds @ proj_w + proj_b                    # (B, T*D)
    y = y.reshape(-1, T, D)
    mean = jnp.mean(y, axis=-1, keepdims=True)
    var = jnp.mean((y - mean) ** 2, axis=-1, keepdims=True)
    return (y - mean) / jnp.sqrt(var + LN_EPS) * ln_gamma + ln_beta


if __name__ == "__main__":
    # Small shapes consistent with the module (production is E=D=1024, T=4):
    # batch=2, clip_embeddings_dim=64, cross_attention_dim=128, T=4.
    B = 2
    clip_embeddings_dim = 64
    cross_attention_dim = 128
    clip_extra_context_tokens = 4

    key = jax.random.PRNGKey(0)
    k_x, k_w, k_b, k_g, k_beta = jax.random.split(key, 5)

    image_embeds = jax.random.normal(k_x, (B, clip_embeddings_dim), jnp.float32)
    proj_w = jax.random.normal(
        k_w, (clip_embeddings_dim,
              clip_extra_context_tokens * cross_attention_dim),
        jnp.float32) * 0.05
    proj_b = jax.random.normal(
        k_b, (clip_extra_context_tokens * cross_attention_dim,),
        jnp.float32) * 0.01
    ln_gamma = 1.0 + 0.1 * jax.random.normal(
        k_g, (cross_attention_dim,), jnp.float32)
    ln_beta = 0.1 * jax.random.normal(
        k_beta, (cross_attention_dim,), jnp.float32)

    ref = _reference(image_embeds, proj_w, proj_b, ln_gamma, ln_beta,
                     clip_extra_context_tokens, cross_attention_dim)

    # f32 path (tolerance allows for MXU default-precision f32 matmuls).
    out = image_proj_model(
        image_embeds, proj_w, proj_b, ln_gamma, ln_beta,
        clip_extra_context_tokens=clip_extra_context_tokens,
        cross_attention_dim=cross_attention_dim)
    out = jax.block_until_ready(out)
    assert out.shape == (B, clip_extra_context_tokens, cross_attention_dim), out.shape
    assert jnp.allclose(out, ref, atol=1e-4, rtol=1e-4), (
        float(jnp.max(jnp.abs(out - ref))))

    # bf16 path (deployment dtype for activations/weights; halves HBM bytes).
    out_bf16 = image_proj_model(
        image_embeds.astype(jnp.bfloat16),
        proj_w.astype(jnp.bfloat16),
        proj_b.astype(jnp.bfloat16),
        ln_gamma, ln_beta,
        clip_extra_context_tokens=clip_extra_context_tokens,
        cross_attention_dim=cross_attention_dim)
    out_bf16 = jax.block_until_ready(out_bf16)
    assert out_bf16.dtype == jnp.bfloat16
    assert jnp.allclose(out_bf16.astype(jnp.float32), ref, atol=1e-1, rtol=1e-1), (
        float(jnp.max(jnp.abs(out_bf16.astype(jnp.float32) - ref))))

    print("KERNEL_OK")
</pallas_src>

<mosaic_0001>
module attributes {stable_mosaic.version = 11 : i64} {
  func.func @_image_proj_kernel(%arg0: i32, %arg1: memref<8x64xf32, #tpu.memory_space<vmem>>, %arg2: memref<64x256xf32, #tpu.memory_space<vmem>>, %arg3: memref<1x256xf32, #tpu.memory_space<vmem>>, %arg4: memref<1x128xf32, #tpu.memory_space<vmem>>, %arg5: memref<1x128xf32, #tpu.memory_space<vmem>>, %arg6: memref<8x256xf32, #tpu.memory_space<vmem>>) attributes {dimension_semantics = [#tpu.dimension_semantics<parallel>], iteration_bounds = array<i64: 2>, scalar_prefetch = 0 : i64, scratch_operands = 0 : i64, tpu.core_type = #tpu.core_type<tc>, window_params = [{pipeline_mode = #tpu.pipeline_mode<synchronous>, transform_indices = @transform_0, window_bounds = array<i64: 8, 64>}, {transform_indices = @transform_1, window_bounds = array<i64: 64, 256>}, {transform_indices = @transform_2, window_bounds = array<i64: 1, 256>}, {pipeline_mode = #tpu.pipeline_mode<synchronous>, transform_indices = @transform_3, window_bounds = array<i64: 1, 128>}, {pipeline_mode = #tpu.pipeline_mode<synchronous>, transform_indices = @transform_4, window_bounds = array<i64: 1, 128>}, {transform_indices = @transform_5, window_bounds = array<i64: 8, 256>}]} {
    %c0 = arith.constant 0 : index
    %c0_0 = arith.constant 0 : index
    %0 = vector.load %arg1[%c0, %c0_0] : memref<8x64xf32, #tpu.memory_space<vmem>>, vector<8x64xf32>
    %c0_1 = arith.constant 0 : index
    %c0_2 = arith.constant 0 : index
    %1 = vector.load %arg2[%c0_1, %c0_2] : memref<64x256xf32, #tpu.memory_space<vmem>>, vector<64x256xf32>
    %cst = arith.constant dense<0.000000e+00> : vector<8x256xf32>
    %2 = tpu.matmul %0, %1, %cst {dimension_numbers = #tpu.dot_dimension_numbers<[1], [0], [0], [1], [0, 0, 1, 1], [], []>} : vector<8x64xf32>, vector<64x256xf32>, vector<8x256xf32> -> vector<8x256xf32>
    %c0_3 = arith.constant 0 : index
    %c0_4 = arith.constant 0 : index
    %3 = vector.load %arg3[%c0_3, %c0_4] : memref<1x256xf32, #tpu.memory_space<vmem>>, vector<1x256xf32>
    %4 = vector.broadcast %3 : vector<1x256xf32> to vector<8x256xf32>
    %5 = arith.addf %2, %4 : vector<8x256xf32>
    %c0_5 = arith.constant 0 : index
    %c0_6 = arith.constant 0 : index
    %6 = vector.load %arg4[%c0_5, %c0_6] : memref<1x128xf32, #tpu.memory_space<vmem>>, vector<1x128xf32>
    %c0_7 = arith.constant 0 : index
    %c0_8 = arith.constant 0 : index
    %7 = vector.load %arg5[%c0_7, %c0_8] : memref<1x128xf32, #tpu.memory_space<vmem>>, vector<1x128xf32>
    %8 = vector.extract_strided_slice %5 {offsets = [0, 0], sizes = [8, 128], strides = [1, 1]} : vector<8x256xf32> to vector<8x128xf32>
    %cst_9 = arith.constant dense<0.000000e+00> : vector<8xf32>
    %9 = vector.multi_reduction <add>, %8, %cst_9 [1] : vector<8x128xf32> to vector<8xf32>
    %10 = vector.shape_cast %9 : vector<8xf32> to vector<8x1xf32>
    %cst_10 = arith.constant 1.280000e+02 : f32
    %11 = vector.broadcast %cst_10 : f32 to vector<8x1xf32>
    %12 = arith.divf %10, %11 : vector<8x1xf32>
    %13 = vector.broadcast %12 : vector<8x1xf32> to vector<8x128xf32>
    %14 = arith.subf %8, %13 : vector<8x128xf32>
    %15 = arith.mulf %14, %14 : vector<8x128xf32>
    %cst_11 = arith.constant dense<0.000000e+00> : vector<8xf32>
    %16 = vector.multi_reduction <add>, %15, %cst_11 [1] : vector<8x128xf32> to vector<8xf32>
    %17 = vector.shape_cast %16 : vector<8xf32> to vector<8x1xf32>
    %cst_12 = arith.constant 1.280000e+02 : f32
    %18 = vector.broadcast %cst_12 : f32 to vector<8x1xf32>
    %19 = arith.divf %17, %18 : vector<8x1xf32>
    %cst_13 = arith.constant 9.99999974E-6 : f32
    %20 = vector.broadcast %cst_13 : f32 to vector<8x1xf32>
    %21 = arith.addf %19, %20 : vector<8x1xf32>
    %22 = math.rsqrt %21 : vector<8x1xf32>
    %23 = vector.broadcast %22 : vector<8x1xf32> to vector<8x128xf32>
    %24 = arith.mulf %14, %23 : vector<8x128xf32>
    %25 = vector.broadcast %6 : vector<1x128xf32> to vector<8x128xf32>
    %26 = arith.mulf %24, %25 : vector<8x128xf32>
    %27 = vector.broadcast %7 : vector<1x128xf32> to vector<8x128xf32>
    %28 = arith.addf %26, %27 : vector<8x128xf32>
    %c0_14 = arith.constant 0 : index
    %c0_15 = arith.constant 0 : index
    %29 = vector.load %arg6[%c0_14, %c0_15] : memref<8x256xf32, #tpu.memory_space<vmem>>, vector<8x128xf32>
    tpu.vector_store %arg6[%c0_14, %c0_15], %28 {strides = array<i32>} : memref<8x256xf32, #tpu.memory_space<vmem>>, vector<8x128xf32>,
    %30 = vector.extract_strided_slice %5 {offsets = [0, 128], sizes = [8, 128], strides = [1, 1]} : vector<8x256xf32> to vector<8x128xf32>
    %cst_16 = arith.constant dense<0.000000e+00> : vector<8xf32>
    %31 = vector.multi_reduction <add>, %30, %cst_16 [1] : vector<8x128xf32> to vector<8xf32>
    %32 = vector.shape_cast %31 : vector<8xf32> to vector<8x1xf32>
    %cst_17 = arith.constant 1.280000e+02 : f32
    %33 = vector.broadcast %cst_17 : f32 to vector<8x1xf32>
    %34 = arith.divf %32, %33 : vector<8x1xf32>
    %35 = vector.broadcast %34 : vector<8x1xf32> to vector<8x128xf32>
    %36 = arith.subf %30, %35 : vector<8x128xf32>
    %37 = arith.mulf %36, %36 : vector<8x128xf32>
    %cst_18 = arith.constant dense<0.000000e+00> : vector<8xf32>
    %38 = vector.multi_reduction <add>, %37, %cst_18 [1] : vector<8x128xf32> to vector<8xf32>
    %39 = vector.shape_cast %38 : vector<8xf32> to vector<8x1xf32>
    %cst_19 = arith.constant 1.280000e+02 : f32
    %40 = vector.broadcast %cst_19 : f32 to vector<8x1xf32>
    %41 = arith.divf %39, %40 : vector<8x1xf32>
    %cst_20 = arith.constant 9.99999974E-6 : f32
    %42 = vector.broadcast %cst_20 : f32 to vector<8x1xf32>
    %43 = arith.addf %41, %42 : vector<8x1xf32>
    %44 = math.rsqrt %43 : vector<8x1xf32>
    %45 = vector.broadcast %44 : vector<8x1xf32> to vector<8x128xf32>
    %46 = arith.mulf %36, %45 : vector<8x128xf32>
    %47 = vector.broadcast %6 : vector<1x128xf32> to vector<8x128xf32>
    %48 = arith.mulf %46, %47 : vector<8x128xf32>
    %49 = vector.broadcast %7 : vector<1x128xf32> to vector<8x128xf32>
    %50 = arith.addf %48, %49 : vector<8x128xf32>
    %c0_21 = arith.constant 0 : index
    %c128 = arith.constant 128 : index
    %51 = vector.load %arg6[%c0_21, %c128] : memref<8x256xf32, #tpu.memory_space<vmem>>, vector<8x128xf32>
    tpu.vector_store %arg6[%c0_21, %c128], %50 {strides = array<i32>} : memref<8x256xf32, #tpu.memory_space<vmem>>, vector<8x128xf32>,
    return
  }
  func.func @transform_0(%arg0: i32) -> (i32, i32) {
    %c0_i32 = arith.constant 0 : i32
    %c0_i32_0 = arith.constant 0 : i32
    %c0_i32_1 = arith.constant 0 : i32
    return %c0_i32, %c0_i32_0 : i32, i32
  }
  func.func @transform_1(%arg0: i32) -> (i32, i32) {
    %c0_i32 = arith.constant 0 : i32
    %c0_i32_0 = arith.constant 0 : i32
    return %c0_i32, %arg0 : i32, i32
  }
  func.func @transform_2(%arg0: i32) -> (i32, i32) {
    %c0_i32 = arith.constant 0 : i32
    %c0_i32_0 = arith.constant 0 : i32
    return %c0_i32, %arg0 : i32, i32
  }
  func.func @transform_3(%arg0: i32) -> (i32, i32) {
    %c0_i32 = arith.constant 0 : i32
    %c0_i32_0 = arith.constant 0 : i32
    %c0_i32_1 = arith.constant 0 : i32
    return %c0_i32, %c0_i32_0 : i32, i32
  }
  func.func @transform_4(%arg0: i32) -> (i32, i32) {
    %c0_i32 = arith.constant 0 : i32
    %c0_i32_0 = arith.constant 0 : i32
    %c0_i32_1 = arith.constant 0 : i32
    return %c0_i32, %c0_i32_0 : i32, i32
  }
  func.func @transform_5(%arg0: i32) -> (i32, i32) {
    %c0_i32 = arith.constant 0 : i32
    %c0_i32_0 = arith.constant 0 : i32
    return %c0_i32, %arg0 : i32, i32
  }
}

</mosaic_0001>

<bundles_post_ra>
// kernel: tpu_custom_call.1
= control target key start
LH: loop header
LB: loop body
LE: loop exit
PB: predicated region body
PF: predicated region fallthrough
CT: control target
= control target key end

     0   :  { %10 = vsyncpa [#allocation3], 0  ;;  %s1025_s0 = inlined_call_operand.hbm [shape: f32[8,64], index: 0, kind: input, shape index: {}]   ;;  %s1026_s1 = inlined_call_operand.hbm [shape: f32[64,512], index: 1, kind: input, shape index: {}]   ;;  %s1027_s2 = inlined_call_operand.vmem [shape: f32[1,512], index: 2, kind: input, shape index: {}]   ;;  %s1028_s3 = inlined_call_operand.vmem [shape: f32[1,128], index: 3, kind: input, shape index: {}]   ;;  %s1029_s4 = inlined_call_operand.vmem [shape: f32[1,128], index: 4, kind: input, shape index: {}]   ;;  %s1030_s5 = inlined_call_operand.hbm [shape: f32[8,512], index: 5, kind: output, shape index: {}]  }
   0x1   :  { %11 = vsyncpa [#allocation6], 0 }
   0x2   :  { %13 = vsyncpa [#allocation6 + $0x1], 0 }
   0x3   :  { %14 = vsyncpa [#allocation4], 0 }
   0x4   :  { %16 = vsyncpa [#allocation4 + $0x1], 0  ;;  %s800_s18 = smov 0   ;;  %s802_s19 = smov 0  }
   0x5   :  { %s804_s20 = smov 0   ;;  %s806_s21 = smov 0  }
   0x6 LB: > { %s821_s22 = sadd.s32 4294967295, %s761_s21   ;;  %s530_s23 = sadd.s32 4294967294, %s761_s21   ;;  %s761_s21 = sphi %s806_s21, %s1055_s21   ;;  %s757_s20 = sphi %s804_s20, %s1054_s20   ;;  %s753_s19 = sphi %s802_s19, %s1053_s19   ;;  %s749_s18 = sphi %s800_s18, %s1052_s18  }
   0x7   : > { %s825_s24 = sadd.s32 1, %s761_s21   ;;  %s50_s25 = sadd.s32 1, %s757_s20 }
   0x8   : > { %s47_s26 = ssub.s32 %s761_s21, %s825_s24  ;;  %p57_p0 = scmp.ne.s32.totalorder %s757_s20, %s753_s19 }
   0x9   : > { %p48_p1 = scmp.eq.s32.totalorder %s47_s26, 0  ;;  %p58_p2 = scmp.eq.s32.totalorder %s761_s21, 0 }
   0xa   : > { %p63_p3 = scmp.ne.s32.totalorder %s753_s19, %s749_s18  ;;  %p1031_p4 = scmp.eq.s32.totalorder %s821_s22, 0 }
   0xb   : > { %s837_s27 = scalar_select %p48_p1, %s757_s20, %s50_s25  }
   0xc   : > { %p839_p5 = por %p58_p2, %p57_p0  ;;  %p845_p6 = por %p1031_p4, %p63_p3 }
   0xd   : > { %p155_p7 = scmp.eq.s32.totalorder %s821_s22, 1  ;;  %p161_p8 = scmp.eq.s32.totalorder %s530_s23, 1 }
   0xe   : > { %s1037_s29 = scalar_select %p845_p6, 1, 0 }
   0xf   : > { %p531_p9 = scmp.ge.s32.totalorder %s761_s21, 1  ;;  %p168_p10 = scmp.lt.s32.totalorder %s761_s21, 3 }
  0x10   : > { %p852_p11 = por %p155_p7, %p57_p0  ;;  %p856_p12 = por %p161_p8, %p63_p3 }
  0x11   : > { %p860_p13 = pnand %p531_p9, %p168_p10  ;;  %s763_s8 = smov [#allocation2]  }
  0x12   : > { %s1038_s30 = scalar_select %p852_p11, 1, 0 }
  0x13   : > { %s1039_s6 = scalar_select %p856_p12, 1, 0 }
  0x14   : > { %s1040_s7 = scalar_select %p860_p13, 1, 0 }
  0x15   : > { %p576_p2 = pneg %p860_p13  ;;  %s181_s9 = sshll.u32 %s763_s8, 4  ;;  %s182_s9 = int_to_ptr.vmem [resolvable:$true] %s181_s9 }
  0x16   : > { %p589_p4 = scmp.lt.s32.totalorder %s761_s21, 2  ;;  %p1041_p0 = scmp.eq.s32.totalorder %s821_s22, 0 }
  0x17   : > { %s198_s11 = sand.u32 1, %s757_s20   ;;  %s633_s16 = scalar_lea.hbm %s1025_s0, 128 }
  0x18   : > { %p870_p7 = pnand %p576_p2, %p1041_p0  ;;  %p877_p3 = pnand %p589_p4, %p839_p5 }
  0x19   : > { %s534_s13 = sshll.u32 %s198_s11, 7  ;;  %p634_p8 = scmp.ne.s32.totalorder %s1025_s0, %s633_s16 }
  0x1a   : > { %s1043_s12 = scalar_select %p877_p3, 1, 0 }
  0x1b   : > { %p635_p9 = pneg %p870_p7  ;;  %p640_p4 = scmp.lt.u32.totalorder %s633_s16, %s1025_s0 }
  0x1d   : > { %p636_p10 = pnand %p635_p9, %p634_p8 }
  0x1f   : > { %p637_p2 = pneg %p636_p10 }
  0x21   : > { %p642_p5 = pnand %p640_p4, %p637_p2 }
  0x23   : > { %645 = shalt.err (!%p642_p5)
}
  0x24   : > { %s646_s28 = scalar_lea.vmem %s182_s9, 128  ;;  %p654_p11 = scmp.lt.s32.totalorder %s182_s9, %s182_s9 }
  0x25   : > { %p647_p0 = scmp.ne.s32.totalorder %s182_s9, %s646_s28  ;;  %p655_p6 = scmp.lt.s32.totalorder %s646_s28, %s646_s28 }
  0x27   : > { %p649_p1 = pnand %p647_p0, %p635_p9  ;;  %p656_p13 = por %p655_p6, %p654_p11 }
  0x29   : > { %p650_p12 = pneg %p649_p1 }
  0x2b   : > { %p657_p3 = pnand %p656_p13, %p650_p12 }
  0x2d   : > { %660 = shalt.err (!%p657_p3)
}
  0x2e   : > { %579 = dma.hbm_to_vmem [thread:$0]  (!%p870_p7), %s1025_s0, 128, %s182_s9, [#allocation3]  }
  0x2f   : > { %s550_s15 = sshll.u32 %s761_s21, 8  ;;  %s202_s16 = scalar_lea.vmem [#allocation5], %s534_s13 }
  0x30   : > { %s209_s17 = sshll.u32 %s202_s16, 4  ;;  %s901_s26 = scalar_lea.hbm %s1026_s1, %s550_s15  ;;  %s903_s17 = int_to_ptr.vmem [resolvable:$true] %s209_s17 }
  0x31   : > { %s905_s10 = scalar_lea.sflag [#allocation6], %s198_s11  ;;  %s661_s28 = scalar_lea.hbm %s901_s26, 2048 }
  0x32   : > { %p662_p6 = scmp.ne.s32.totalorder %s901_s26, %s661_s28  ;;  %p1044_p11 = scmp.ne.s32.totalorder %s1043_s12, 0 }
  0x33   : > { %s666_s8 = scalar_lea.hbm %s1026_s1, 4096  ;;  %p667_p7 = scmp.lt.u32.totalorder %s901_s26, %s1026_s1 }
  0x34   : > { %p663_p12 = pneg %p1044_p11  ;;  %p668_p3 = scmp.lt.u32.totalorder %s666_s8, %s661_s28 }
  0x35   : > { %p670_p9 = scmp.lt.u32.totalorder %s661_s28, %s901_s26 }
  0x36   : > { %p664_p13 = pnand %p663_p12, %p662_p6  ;;  %p669_p8 = por %p668_p3, %p667_p7 }
  0x38   : > { %p665_p1 = pneg %p664_p13  ;;  %p671_p10 = por %p670_p9, %p669_p8 }
  0x3a   : > { %p672_p2 = pnand %p671_p10, %p665_p1 }
  0x3c   : > { %675 = shalt.err (!%p672_p2)
}
  0x3d   : > { %s676_s11 = scalar_lea.vmem %s903_s17, 2048  ;;  %s764_s16 = smov [#allocation5]  }
  0x3e   : > { %p677_p4 = scmp.ne.s32.totalorder %s903_s17, %s676_s11  ;;  %s681_s23 = sshll.u32 %s764_s16, 4  ;;  %s682_s23 = int_to_ptr.vmem [resolvable:$false] %s681_s23 }
  0x3f   : > { %s683_s25 = scalar_lea.vmem %s682_s23, 4096  ;;  %p684_p6 = scmp.lt.s32.totalorder %s903_s17, %s682_s23 }
  0x40   : > { %p679_p5 = pnand %p677_p4, %p663_p12  ;;  %p685_p13 = scmp.lt.s32.totalorder %s683_s25, %s676_s11 }
  0x42   : > { %p680_p0 = pneg %p679_p5  ;;  %p686_p7 = por %p685_p13, %p684_p6 }
  0x44   : > { %p687_p3 = pnand %p686_p7, %p680_p0 }
  0x46   : > { %690 = shalt.err (!%p687_p3)
}
  0x47   : > { %s765_s28 = smov 512   ;;  %s766_s9 = smov 256  }
  0x48   : > { %s767_s13 = smov 16   ;;  %p1045_p12 = scmp.ne.s32.totalorder %s1040_s7, 0 }
  0x49   : > { %583 = dma.hbm_to_vmem [thread:$0]  (!%p1044_p11), %s901_s26, 2048, %s903_s17, %s905_s10, %s765_s28, %s766_s9, %s767_s13  }
  0x4a   : > { %229 = sbr.rel (%p1045_p12) target bundleno = 648 (0x288), region = 40  ;;  %p1046_p1 = scmp.eq.s32.totalorder (!%p1045_p12), %s821_s22, 0 }
  0x51   : > { %736 = dma.done.wait (%p1046_p1), [#allocation3], 128   ;;  %p1047_p8 = pmov %p1046_p1 }
  0x52   : > { %s940_s8 = sand.u32 1, %s753_s19   ;;  %p1048_p11 = scmp.ne.s32.totalorder %s1037_s29, 0 }
  0x53   : > { %738 = vsyncadd (%p1047_p8), [#allocation3], 4294967168  ;;  %s539_s14 = sshll.u32 %s940_s8, 7  ;;  %s236_s15 = scalar_lea.sflag [#allocation6], %s940_s8 }
  0x54   : > { %s944_s11 = scalar_lea.vmem [#allocation5], %s539_s14 }
  0x55   : > { %740 = dma.done.wait (%p1048_p11), %s236_s15, 2048  }
  0x56   : > { %742 = vsyncadd (%p1048_p11), %s236_s15, 4294965248  ;;  %v768_v0 = vmov 0.0   ;;  %v279_v1 = vld [vmem:[%s944_s11 + $0x8] sm:$0xff]  ;;  %v281_v2 = vld [vmem:[%s944_s11 + $0x18] sm:$0xff]  ;;  %vm306_vm0 = vcmask 523264   ;;  %s541_s29 = sshll.u32 %s821_s22, 1  ;;  %v296_v26 = vlaneseq }
  0x57   : > { %374 = vmatprep.mubr.f32.mxu0 %v768_v0  ;;  %v278_v3 = vld [vmem:[%s944_s11] sm:$0xff]  ;;  %v552_v4 = vpack.c.bf16 %v281_v2, %v279_v1  ;;  %v280_v5 = vld [vmem:[%s944_s11 + $0x10] sm:$0xff]  ;;  %v283_v6 = vld [vmem:[%s944_s11 + $0x28] sm:$0xff]  ;;  %p272_p9 = scmp.lt.s32.totalorder %s541_s29, 3  ;;  %s540_s16 = sshll.u32 %s940_s8, 4 }
  0x58   : > { %v285_v7 = vld [vmem:[%s944_s11 + $0x38] sm:$0xff]  ;;  %v554_v8 = vpack.c.bf16 %v280_v5, %v278_v3  ;;  %v282_v10 = vld [vmem:[%s944_s11 + $0x20] sm:$0xff]  ;;  %v284_v11 = vld [vmem:[%s944_s11 + $0x30] sm:$0xff]  ;;  %v297_v27 = vshrl.u32 %v296_v26, 7  ;;  %s551_s28 = sshll.u32 %s821_s22, 8  ;;  %s269_s9 = scalar_lea.vmem [#allocation7], %s540_s16 }
  0x59   : > { %v556_v9 = vpack.c.bf16 %v285_v7, %v283_v6  ;;  %v287_v12 = vld [vmem:[%s944_s11 + $0x48] sm:$0xff]  ;;  %553 = vmatprep.subr.bf16.mxu0 %v552_v4  ;;  %v289_v13 = vld [vmem:[%s944_s11 + $0x58] sm:$0xff]  ;;  %v558_v14 = vpack.c.bf16 %v284_v11, %v282_v10  ;;  %v286_v16 = vld [vmem:[%s944_s11 + $0x40] sm:$0xff]  ;;  %s1057_s29 = smov (!%p272_p9, %s541_s29), 3  ;;  %s439_s13 = sshll.u32 %s269_s9, 4  ;;  %s983_s13 = int_to_ptr.vmem [resolvable:$true] %s439_s13 }
  0x5a   : > { %555 = vmatpush1.bf16.msra.mxu0 %v554_v8  ;;  %v560_v15 = vpack.c.bf16 %v289_v13, %v287_v12  ;;  %v288_v17 = vld [vmem:[%s944_s11 + $0x50] sm:$0xff]  ;;  %v291_v18 = vld [vmem:[%s944_s11 + $0x68] sm:$0xff]  ;;  %v293_v19 = vld [vmem:[%s944_s11 + $0x78] sm:$0xff]  ;;  %s274_s17 = scalar_lea.vmem %s1027_s2, %s1057_s29  ;;  %v298_v28 = vsub.s32 0, %v297_v27  ;;  %v302_v31 = vsub.s32 1, %v297_v27  ;;  %s425_s29 = scalar_lea.sflag [#allocation4], %s940_s8 }
  0x5b   : > { %557 = vmatprep.subr.bf16.mxu0 %v556_v9  ;;  %v562_v20 = vpack.c.bf16 %v288_v17, %v286_v16  ;;  %v564_v21 = vpack.c.bf16 %v293_v19, %v291_v18  ;;  %v290_v22 = vld [vmem:[%s944_s11 + $0x60] sm:$0xff]  ;;  %v292_v23 = vld [vmem:[%s944_s11 + $0x70] sm:$0xff]  ;;  %v277_v25 = vld [vmem:[#allocation2] sm:$0xff]  ;;  %s981_s11 = scalar_lea.hbm %s1030_s5, %s551_s28  ;;  %s691_s7 = scalar_lea.vmem %s983_s13, 256 }
  0x5c   : > { %v566_v24 = vpack.c.bf16 %v292_v23, %v290_v22  ;;  %v294_v29 = vld [vmem:[%s274_s17] sm:$0x3]  ;;  %p692_p10 = scmp.ne.s32.totalorder %s983_s13, %s691_s7  ;;  %p1049_p2 = scmp.ne.s32.totalorder %s1038_s30, 0 }
  0x5d   : > { %v299_v30 = vrot.slane %v294_v29, %v298_v28  ;;  %v303_v34 = vrot.slane %v294_v29, %v302_v31  ;;  %v543_v52 = vld [vmem:[%s1028_s3] ss:$0 sm:$0xff]  ;;  %s769_s22 = smov [#allocation7]  }
  0x5e   : > { %559 = vmatpush1.bf16.msra.mxu0 %v558_v14  ;;  %v544_v54 = vld [vmem:[%s1029_s4] ss:$0 sm:$0xff]  ;;  %p693_p4 = pnand %p692_p10, %p1049_p2  ;;  %s695_s12 = sshll.u32 %s769_s22, 4  ;;  %s696_s12 = int_to_ptr.vmem [resolvable:$false] %s695_s12 }
  0x5f   : > { %561 = vmatprep.subr.bf16.mxu0 %v560_v15  ;;  %s697_s17 = scalar_lea.vmem %s696_s12, 512  ;;  %p698_p0 = scmp.lt.s32.totalorder %s983_s13, %s696_s12 }
  0x60   : > { %p694_p5 = pneg %p693_p4  ;;  %p699_p6 = scmp.lt.s32.totalorder %s697_s17, %s691_s7 }
  0x62   : > { %563 = vmatpush1.bf16.msra.mxu0 %v562_v20  ;;  %p700_p13 = por %p699_p6, %p698_p0 }
  0x63   : > { %565 = vmatprep.subr.bf16.mxu0 %v564_v21 }
  0x64   : > { %p701_p7 = pnand %p700_p13, %p694_p5 }
  0x66   : > { %567 = vmatpush1.bf16.msra.mxu0 %v566_v24 }
  0x69   : > { %542 = vmatmul.mubr.msk.f32.vlgmr.msra.gmra.mrb[0].mxu0 %vm306_vm0, %v277_v25 }
 0x13c   : > { %v376_v32 = vpop.f32.mrb[0].mxu0 }
 0x13d   : > { %v377_v33 = vadd.f32 %v376_v32, %v299_v30  ;;  %v378_v35 = vpop.f32.mrb[1].mxu0 }
 0x13e   : > { %v379_v36 = vadd.f32 %v378_v35, %v303_v34 }
 0x13f   : > { %383 = vadd.xlane.f32.xlu0 %v377_v33 }
 0x143   : > { %410 = vadd.xlane.f32.xlu0 %v379_v36 }
 0x1cc   : > { %v384_v37 = vpop.xlane.xlu0 %383 }
 0x1cd   : > { %v386_v38 = vmul.f32 0.0078125, %v384_v37 }
 0x1cf   : > { %v387_v39 = vsub.f32 %v377_v33, %v386_v38 }
 0x1d0   : > { %v411_v40 = vpop.xlane.xlu0 %410 }
 0x1d1   : > { %v412_v41 = vmul.f32 0.0078125, %v411_v40  ;;  %v388_v42 = vmul.f32 %v387_v39, %v387_v39 }
 0x1d3   : > { %v413_v43 = vsub.f32 %v379_v36, %v412_v41  ;;  %389 = vadd.xlane.f32.xlu1 %v388_v42 }
 0x1d5   : > { %v414_v44 = vmul.f32 %v413_v43, %v413_v43 }
 0x1d7   : > { %415 = vadd.xlane.f32.xlu1 %v414_v44 }
 0x260   : > { %v390_v45 = vpop.xlane.xlu1 %389 }
 0x261   : > { %v391_v46 = vmul.f32 0.0078125, %v390_v45 }
 0x263   : > { %v392_v47 = vadd.f32 1e-05, %v391_v46 }
 0x264   : > { %v416_v48 = vpop.xlane.xlu1 %415 }
 0x265   : > { %629 = vrsqrt.f32 %v392_v47  ;;  %v417_v49 = vmul.f32 0.0078125, %v416_v48 }
 0x267   : > { %v418_v50 = vadd.f32 1e-05, %v417_v49 }
 0x269   : > { %631 = vrsqrt.f32 %v418_v50 }
 0x26f   : > { %v630_v51 = vpop.eup %629 }
 0x270   : > { %v394_v53 = vmul.f32 %v630_v51, %v387_v39 }
 0x272   : > { %v401_v55 = vmul.f32 %v543_v52, %v394_v53 }
 0x273   : > { %v632_v56 = vpop.eup %631 }
 0x274   : > { %v420_v57 = vmul.f32 %v632_v56, %v413_v43  ;;  %v408_v58 = vadd.f32 %v544_v54, %v401_v55 }
 0x276   : > { %v421_v59 = vmul.f32 %v543_v52, %v420_v57  ;;  %409 = vst [vmem:[%s269_s9] sm:$0xff] %v408_v58 }
 0x278   : > { %v422_v60 = vadd.f32 %v544_v54, %v421_v59 }
 0x27a   : > { %423 = vst [vmem:[%s269_s9 + $0x8] sm:$0xff] %v422_v60 }
 0x27b   : > { %704 = shalt.err (!%p701_p7)
}
 0x27c   : > { %s705_s8 = scalar_lea.hbm %s981_s11, 256  ;;  %s709_s16 = scalar_lea.hbm %s1030_s5, 512 }
 0x27d   : > { %p706_p3 = scmp.ne.s32.totalorder %s981_s11, %s705_s8  ;;  %p710_p8 = scmp.lt.u32.totalorder %s981_s11, %s1030_s5 }
 0x27e   : > { %p711_p11 = scmp.lt.u32.totalorder %s709_s16, %s705_s8  ;;  %p713_p10 = scmp.lt.u32.totalorder %s705_s8, %s981_s11 }
 0x27f   : > { %p707_p12 = pnand %p706_p3, %p1049_p2 }
 0x280   : > { %p712_p9 = por %p711_p11, %p710_p8 }
 0x281   : > { %p708_p1 = pneg %p707_p12 }
 0x282   : > { %p714_p4 = por %p713_p10, %p712_p9 }
 0x284   : > { %p715_p5 = pnand %p714_p4, %p708_p1 }
 0x286   : > { %718 = shalt.err (!%p715_p5)
}
 0x287   : > { %574 = dma.vmem_to_hbm [thread:$0]  (%p1049_p2), %s983_s13, 256, %s981_s11, %s425_s29  }
 0x288 PF: > { %s451_s28 = sand.u32 1, %s749_s18   ;;  %p1050_p0 = scmp.ne.s32.totalorder %s1039_s6, 0 }
 0x289   : > { %p1051_p6 = scmp.ge.s32.totalorder %s761_s21, 2  ;;  %s452_s9 = scalar_lea.sflag [#allocation4], %s451_s28 }
 0x28b   : > { %p585_p13 = pnand %p1051_p6, %p1050_p0 }
 0x28d   : > { %744 = dma.done.wait (!%p585_p13), %s452_s9, 256  }
 0x28e   : > { %746 = vsyncadd (!%p585_p13), %s452_s9, 4294967040  ;;  %p19_p7 = scmp.ge.s32.totalorder %s825_s24, 4   ;;  %s1052_s18 = smov %s753_s19 }
 0x28f   : > { %s1053_s19 = smov %s757_s20  ;;  %s1054_s20 = smov %s837_s27 }
 0x290   : > { %s1055_s21 = smov %s825_s24  ;;  %21 = sbr.rel (!%p19_p7) target bundleno = 6 (0x6), region = 93 }
 0x297   :  { %457 = vsyncpa [#allocation3], 1 }
 0x298   :  { %459 = vsyncpa [#allocation3 + $0x1], 1 }
 0x299   :  { %460 = vsyncpa [#allocation6], 1 }
 0x29a   :  { %462 = vsyncpa [#allocation6 + $0x1], 1 }
 0x29b   :  { %463 = vsyncpa [#allocation4], 1 }
 0x29c   :  { %465 = vsyncpa [#allocation4 + $0x1], 1 }

</bundles_post_ra>
